<compile_context>
chip_gen: v5e
topology: v5e:2x2
jax: 0.10.0
libtpu: 0.0.40
codegen_flags: <defaults>
</compile_context>

<pallas_src>
import functools
import math

import jax
import jax.numpy as jnp
from jax import lax
from jax.experimental import pallas as pl
from jax.experimental.pallas import tpu as pltpu

LANES = 128
MAX_ACC_ROWS = 64          # up to 8 independent (8,128) f32 accumulator vregs
TARGET_BLOCK_BYTES = 4 << 20   # ~4 MiB per input block, dtype-independent in bytes
VMEM_LIMIT_BYTES = 48 * 1024 * 1024
FUSE_STACK_MAX_BYTES = 8 << 20  # below this, the jnp.stack copy in the list path is cheap


def _min_sublanes(dtype):
    """Minimum sublane multiple for a dtype's TPU tile."""
    itemsize = jnp.dtype(dtype).itemsize
    return {4: 8, 2: 16, 1: 32}.get(itemsize, 8)


def _sq_err_partial_kernel(a_ref, p_ref, out_ref, acc_ref, *,
                           rows, tm, bps, blocks, acc_rows, n_chunks, mask_tail):
    """Accumulate sum((a-p)^2) for this super-block into a VMEM vector accumulator.

    Grid: (n_super [parallel], bps [arbitrary]). The (acc_rows,128) VMEM accumulator is
    reset at i==0 and reduced to a scalar SMEM partial at the last inner step, so every
    real step is pure VPU work (chunked vreg adds, no per-step XLU reduce, no serial
    SMEM read-modify-write). Phantom steps (odd block count) contribute nothing.
    """
    s = pl.program_id(0)
    i = pl.program_id(1)
    gb = s * bps + i  # global (unclamped) row-block index

    @pl.when(i == 0)
    def _():
        acc_ref[...] = jnp.zeros_like(acc_ref)

    def accumulate(masked):
        def body(j, acc):
            off = pl.multiple_of(j * acc_rows, acc_rows)
            a_c = a_ref[pl.ds(off, acc_rows), :].astype(jnp.float32)
            p_c = p_ref[pl.ds(off, acc_rows), :].astype(jnp.float32)
            d = a_c - p_c
            sq = d * d
            if masked:
                # The tail block reads past the valid rows; those VMEM contents are
                # undefined, so select 0 there (jnp.where's select does not propagate
                # NaN/Inf from the unselected branch).
                ridx = gb * tm + off + lax.broadcasted_iota(
                    jnp.int32, (acc_rows, LANES), 0)
                sq = jnp.where(ridx < rows, sq, 0.0)
            return acc + sq

        init = jnp.zeros((acc_rows, LANES), jnp.float32)
        part = lax.fori_loop(0, n_chunks, body, init, unroll=min(8, n_chunks))
        acc_ref[...] += part

    if mask_tail:
        @pl.when(jnp.logical_and(gb < blocks, gb != blocks - 1))
        def _():
            accumulate(False)

        @pl.when(gb == blocks - 1)  # tail block is never a phantom step
        def _():
            accumulate(True)
    else:
        @pl.when(gb < blocks)  # skip phantom step (odd block count, second super-block)
        def _():
            accumulate(False)

    @pl.when(i == pl.num_programs(1) - 1)
    def _():
        out_ref[0, 0] = jnp.sum(acc_ref[...])


def _sum_sq_pallas(a2d, p2d, target_block_bytes):
    """Pallas sum((a2d - p2d)^2) over a (rows, 128) pair. Returns an f32 scalar."""
    rows = a2d.shape[0]
    itm_a = jnp.dtype(a2d.dtype).itemsize
    itm_p = jnp.dtype(p2d.dtype).itemsize
    itemsize = max(itm_a, itm_p)
    min_sub = max(_min_sublanes(a2d.dtype), _min_sublanes(p2d.dtype))

    # Byte-constant block: ~target_block_bytes per input block regardless of dtype.
    block_rows = max(min_sub, target_block_bytes // (LANES * itemsize))
    tm = max(min_sub, (min(block_rows, rows) // min_sub) * min_sub)
    blocks = pl.cdiv(rows, tm)
    mask_tail = (rows % tm) != 0

    # Always split into 2 super-blocks when possible so the "parallel" axis can be
    # sharded across the 2 v7x TensorCores (neutral on v5e/v6e). Odd block counts get
    # one phantom step on the second super-block (index_map clamped, work skipped).
    n_super = 2 if blocks >= 2 else 1
    bps = pl.cdiv(blocks, n_super)

    acc_rows = math.gcd(tm, MAX_ACC_ROWS)   # multiple of 8, divides tm
    n_chunks = tm // acc_rows

    kernel = functools.partial(
        _sq_err_partial_kernel, rows=rows, tm=tm, bps=bps, blocks=blocks,
        acc_rows=acc_rows, n_chunks=n_chunks, mask_tail=mask_tail)

    def in_map(s, i):
        return (jnp.minimum(s * bps + i, blocks - 1), 0)

    cost = pl.CostEstimate(
        flops=3 * rows * LANES,                       # sub + mul + add per element
        transcendentals=0,
        bytes_accessed=rows * LANES * (itm_a + itm_p) + n_super * 4,
    )

    partials = pl.pallas_call(
        kernel,
        out_shape=jax.ShapeDtypeStruct((n_super, 1), jnp.float32),
        grid_spec=pltpu.PrefetchScalarGridSpec(
            num_scalar_prefetch=0,
            grid=(n_super, bps),
            in_specs=[
                pl.BlockSpec((tm, LANES), in_map),
                pl.BlockSpec((tm, LANES), in_map),
            ],
            out_specs=pl.BlockSpec(
                (1, 1), lambda s, i: (s, 0), memory_space=pltpu.SMEM),
            scratch_shapes=[pltpu.VMEM((acc_rows, LANES), jnp.float32)],
        ),
        compiler_params=pltpu.CompilerParams(
            dimension_semantics=("parallel", "arbitrary"),
            vmem_limit_bytes=VMEM_LIMIT_BYTES,
        ),
        cost_estimate=cost,
    )(a2d, p2d)

    return jnp.sum(partials)


@functools.partial(jax.jit, static_argnames=("target_block_bytes",))
def _mse_pallas(a, p, target_block_bytes=TARGET_BLOCK_BYTES):
    assert a.shape == p.shape, f"shape mismatch: {a.shape} vs {p.shape}"

    a_flat = jnp.ravel(a)
    p_flat = jnp.ravel(p)
    n = a_flat.shape[0]
    min_sub = max(_min_sublanes(a.dtype), _min_sublanes(p.dtype))

    # Kernel covers the 128-aligned prefix (free reshape of a contiguous array, no pad
    # copy); the < 128*min_sub element remainder is summed with plain jnp (negligible).
    n_main = (n // LANES) * LANES
    rows = n_main // LANES
    if rows < min_sub:
        n_main = 0  # tiny input: pure-jnp path (not worth a kernel launch)

    total = jnp.float32(0.0)
    if n_main > 0:
        a2d = a_flat[:n_main].reshape(n_main // LANES, LANES)
        p2d = p_flat[:n_main].reshape(n_main // LANES, LANES)
        total = total + _sum_sq_pallas(a2d, p2d, target_block_bytes)
    if n_main < n:
        at = a_flat[n_main:].astype(jnp.float32)
        pt = p_flat[n_main:].astype(jnp.float32)
        total = total + jnp.sum((at - pt) * (at - pt))

    return total / jnp.float32(n)


class DynamicsLoss:
    """JAX/Pallas port of the PyTorch DynamicsLoss module.

    forward(anchor, positive, negative):
      - if anchor/positive are lists: mean over per-pair MSE losses
      - else: MSE(anchor, positive)
    `negative` is accepted but unused, matching the reference module.
    """

    def __init__(self, config=None):
        self.config = config  # the reference module has no parameters

    def forward(self, anchor, positive, negative=None):
        if isinstance(anchor, (list, tuple)) and isinstance(positive, (list, tuple)):
            assert len(anchor) == len(positive) and len(anchor) > 0
            shapes = {tuple(a.shape) for a in anchor} | {tuple(p.shape) for p in positive}
            dtypes = {jnp.dtype(a.dtype) for a in anchor} | {jnp.dtype(p.dtype) for p in positive}
            total_bytes = sum(int(a.size) * jnp.dtype(a.dtype).itemsize for a in anchor)
            if len(shapes) == 1 and len(dtypes) == 1 and total_bytes <= FUSE_STACK_MAX_BYTES:
                # Small equal-size pairs: mean of per-pair MSEs == MSE of the stacked
                # tensors, so fuse into one kernel launch. For large tensors the stack
                # is a full HBM copy (doubles traffic), so use per-pair calls instead.
                return _mse_pallas(jnp.stack(list(anchor)), jnp.stack(list(positive)))
            losses = [_mse_pallas(a, p) for a, p in zip(anchor, positive)]
            return jnp.mean(jnp.stack(losses))
        return _mse_pallas(anchor, positive)

    __call__ = forward


if __name__ == "__main__":
    key = jax.random.PRNGKey(0)
    k1, k2, k3, k4, k5 = jax.random.split(key, 5)

    # Small NCHW-like embeddings, consistent with a conv feature map.
    shape = (2, 4, 16, 16)
    anchor = jax.random.normal(k1, shape, dtype=jnp.float32)
    positive = jax.random.normal(k2, shape, dtype=jnp.float32)
    negative = jax.random.normal(k3, shape, dtype=jnp.float32)  # unused, as in torch

    loss_mod = DynamicsLoss(config=None)

    # Single-tensor path.
    loss = jax.block_until_ready(loss_mod(anchor, positive, negative))

    # List path (small equal shapes -> fused single kernel launch).
    anchors = [anchor, jax.random.normal(k4, shape, dtype=jnp.float32)]
    positives = [positive, jax.random.normal(k5, shape, dtype=jnp.float32)]
    list_loss = jax.block_until_ready(loss_mod(anchors, positives, negative))

    # Non-multiple-of-128 shape -> kernel on the 1024-element prefix + jnp tail (no pad copy).
    odd_shape = (3, 5, 7, 11)  # 1155 elements
    a_odd = jax.random.normal(k1, odd_shape, dtype=jnp.float32)
    p_odd = jax.random.normal(k2, odd_shape, dtype=jnp.float32)
    odd_loss = jax.block_until_ready(loss_mod(a_odd, p_odd, None))

    # bf16 inputs (read as bf16 in HBM, accumulated in f32 in-kernel).
    a_bf = anchor.astype(jnp.bfloat16)
    p_bf = positive.astype(jnp.bfloat16)
    bf_loss = jax.block_until_ready(loss_mod(a_bf, p_bf, None))

    # Multi-block path with a small forced block size: exercises the 2-super-block split
    # with an odd block count (phantom last step) and the masked partial tail tile.
    mb_shape = (5, 8, 128)  # 5120 elements -> 40 rows; block_rows=16 -> 3 blocks
    a_mb = jax.random.normal(k4, mb_shape, dtype=jnp.float32)
    p_mb = jax.random.normal(k5, mb_shape, dtype=jnp.float32)
    mb_loss = jax.block_until_ready(_mse_pallas(a_mb, p_mb, target_block_bytes=8 * 1024))

    # Reference checks against plain JAX mean-squared-error.
    ref = jnp.mean((anchor - positive) ** 2)
    ref_list = jnp.mean(
        jnp.stack([jnp.mean((a - p) ** 2) for a, p in zip(anchors, positives)]))
    ref_odd = jnp.mean((a_odd - p_odd) ** 2)
    ref_bf = jnp.mean((a_bf.astype(jnp.float32) - p_bf.astype(jnp.float32)) ** 2)
    ref_mb = jnp.mean((a_mb - p_mb) ** 2)

    assert jnp.allclose(loss, ref, rtol=1e-5, atol=1e-6), (loss, ref)
    assert jnp.allclose(list_loss, ref_list, rtol=1e-5, atol=1e-6), (list_loss, ref_list)
    assert jnp.allclose(odd_loss, ref_odd, rtol=1e-5, atol=1e-6), (odd_loss, ref_odd)
    assert jnp.allclose(bf_loss, ref_bf, rtol=1e-3, atol=1e-4), (bf_loss, ref_bf)
    assert jnp.allclose(mb_loss, ref_mb, rtol=1e-5, atol=1e-6), (mb_loss, ref_mb)

    print("KERNEL_OK")
</pallas_src>

<mosaic_0001>
module attributes {stable_mosaic.version = 11 : i64} {
  func.func @_sq_err_partial_kernel(%arg0: i32, %arg1: i32, %arg2: memref<16x128xf32, #tpu.memory_space<vmem>>, %arg3: memref<16x128xf32, #tpu.memory_space<vmem>>, %arg4: memref<1x1xf32, #tpu.memory_space<smem>>, %arg5: memref<16x128xf32, #tpu.memory_space<vmem>>) attributes {dimension_semantics = [#tpu.dimension_semantics<parallel>, #tpu.dimension_semantics<arbitrary>], iteration_bounds = array<i64: 1, 1>, scalar_prefetch = 0 : i64, scratch_operands = 1 : i64, tpu.core_type = #tpu.core_type<tc>, window_params = [{transform_indices = @transform_0, window_bounds = array<i64: 16, 128>}, {transform_indices = @transform_1, window_bounds = array<i64: 16, 128>}, {transform_indices = @transform_2, window_bounds = array<i64: 1, 1>}]} {
    %c1_i32 = arith.constant 1 : i32
    %0 = arith.muli %arg0, %c1_i32 : i32
    %1 = arith.addi %0, %arg1 : i32
    %c0_i32 = arith.constant 0 : i32
    %2 = arith.cmpi eq, %arg1, %c0_i32 : i32
    %3 = arith.extui %2 : i1 to i32
    %c0_i32_0 = arith.constant 0 : i32
    %4 = arith.cmpi ne, %3, %c0_i32_0 : i32
    scf.if %4 {
      %cst = arith.constant 0.000000e+00 : f32
      %11 = vector.broadcast %cst : f32 to vector<16x128xf32>
      %c0 = arith.constant 0 : index
      %c0_5 = arith.constant 0 : index
      %12 = vector.load %arg5[%c0, %c0_5] : memref<16x128xf32, #tpu.memory_space<vmem>>, vector<16x128xf32>
      tpu.vector_store %arg5[%c0, %c0_5], %11 {strides = array<i32>} : memref<16x128xf32, #tpu.memory_space<vmem>>, vector<16x128xf32>,
    } else {
    }
    %c1_i32_1 = arith.constant 1 : i32
    %5 = arith.cmpi slt, %1, %c1_i32_1 : i32
    %6 = arith.extui %5 : i1 to i32
    %c0_i32_2 = arith.constant 0 : i32
    %7 = arith.cmpi ne, %6, %c0_i32_2 : i32
    scf.if %7 {
      %cst = arith.constant 0.000000e+00 : f32
      %11 = vector.broadcast %cst : f32 to vector<16x128xf32>
      %c0_i32_5 = arith.constant 0 : i32
      %c16_i32 = arith.constant 16 : i32
      %12 = arith.muli %c0_i32_5, %c16_i32 : i32
      %13 = tpu.assume_multiple %12, 16 : i32
      %14 = arith.index_cast %13 : i32 to index
      %c0 = arith.constant 0 : index
      %15 = vector.load %arg2[%14, %c0] : memref<16x128xf32, #tpu.memory_space<vmem>>, vector<16x128xf32>
      %16 = arith.index_cast %13 : i32 to index
      %c0_6 = arith.constant 0 : index
      %17 = vector.load %arg3[%16, %c0_6] : memref<16x128xf32, #tpu.memory_space<vmem>>, vector<16x128xf32>
      %18 = arith.subf %15, %17 : vector<16x128xf32>
      %19 = arith.mulf %18, %18 : vector<16x128xf32>
      %20 = arith.addf %11, %19 : vector<16x128xf32>
      %c1_i32_7 = arith.constant 1 : i32
      %c0_8 = arith.constant 0 : index
      %c0_9 = arith.constant 0 : index
      %21 = vector.load %arg5[%c0_8, %c0_9] : memref<16x128xf32, #tpu.memory_space<vmem>>, vector<16x128xf32>
      %22 = arith.addf %21, %20 : vector<16x128xf32>
      %c0_10 = arith.constant 0 : index
      %c0_11 = arith.constant 0 : index
      %23 = vector.load %arg5[%c0_10, %c0_11] : memref<16x128xf32, #tpu.memory_space<vmem>>, vector<16x128xf32>
      tpu.vector_store %arg5[%c0_10, %c0_11], %22 {strides = array<i32>} : memref<16x128xf32, #tpu.memory_space<vmem>>, vector<16x128xf32>,
    } else {
    }
    %c0_i32_3 = arith.constant 0 : i32
    %8 = arith.cmpi eq, %arg1, %c0_i32_3 : i32
    %9 = arith.extui %8 : i1 to i32
    %c0_i32_4 = arith.constant 0 : i32
    %10 = arith.cmpi ne, %9, %c0_i32_4 : i32
    scf.if %10 {
      %c0 = arith.constant 0 : index
      %c0_5 = arith.constant 0 : index
      %11 = vector.load %arg5[%c0, %c0_5] : memref<16x128xf32, #tpu.memory_space<vmem>>, vector<16x128xf32>
      %12 = vector.shape_cast %11 : vector<16x128xf32> to vector<1x16x128xf32>
      %cst = arith.constant dense<0.000000e+00> : vector<1xf32>
      %13 = vector.multi_reduction <add>, %12, %cst [1, 2] : vector<1x16x128xf32> to vector<1xf32>
      %14 = vector.shape_cast %13 : vector<1xf32> to vector<1x1x1xf32>
      %15 = vector.extract %14[0, 0, 0] : f32 from vector<1x1x1xf32>
      %c0_6 = arith.constant 0 : index
      %c0_7 = arith.constant 0 : index
      %16 = memref.load %arg4[%c0_6, %c0_7] : memref<1x1xf32, #tpu.memory_space<smem>>
      memref.store %15, %arg4[%c0_6, %c0_7] : memref<1x1xf32, #tpu.memory_space<smem>>
    } else {
    }
    return
  }
  func.func @transform_0(%arg0: i32, %arg1: i32) -> (i32, i32) {
    %c1_i32 = arith.constant 1 : i32
    %0 = arith.muli %arg0, %c1_i32 : i32
    %1 = arith.addi %0, %arg1 : i32
    %c0_i32 = arith.constant 0 : i32
    %2 = arith.minsi %1, %c0_i32 : i32
    %c0_i32_0 = arith.constant 0 : i32
    %c0_i32_1 = arith.constant 0 : i32
    return %2, %c0_i32_0 : i32, i32
  }
  func.func @transform_1(%arg0: i32, %arg1: i32) -> (i32, i32) {
    %c1_i32 = arith.constant 1 : i32
    %0 = arith.muli %arg0, %c1_i32 : i32
    %1 = arith.addi %0, %arg1 : i32
    %c0_i32 = arith.constant 0 : i32
    %2 = arith.minsi %1, %c0_i32 : i32
    %c0_i32_0 = arith.constant 0 : i32
    %c0_i32_1 = arith.constant 0 : i32
    return %2, %c0_i32_0 : i32, i32
  }
  func.func @transform_2(%arg0: i32, %arg1: i32) -> (i32, i32) {
    %c0_i32 = arith.constant 0 : i32
    %c0_i32_0 = arith.constant 0 : i32
    return %arg0, %c0_i32 : i32, i32
  }
}

</mosaic_0001>

<bundles_post_ra>
// kernel: _mse_pallas.1
= control target key start
LH: loop header
LB: loop body
LE: loop exit
PB: predicated region body
PF: predicated region fallthrough
CT: control target
= control target key end

     0   :  { %s195_s0 = inlined_call_operand.vmem [shape: f32[16,128], index: 0, kind: input, shape index: {}]   ;;  %s196_s1 = inlined_call_operand.vmem [shape: f32[16,128], index: 1, kind: input, shape index: {}]   ;;  %s197_s2 = inlined_call_operand.hbm [shape: f32[1,1], index: 2, kind: output, shape index: {}]  }
   0x1   :  { %v87_v0 = vld [vmem:[%s195_s0] sm:$0xff]  ;;  %v88_v1 = vld [vmem:[%s195_s0 + $0x8] sm:$0xff] }
   0x2   :  { %v89_v2 = vld [vmem:[%s196_s1] sm:$0xff]  ;;  %v90_v3 = vld [vmem:[%s196_s1 + $0x8] sm:$0xff] }
   0x3   :  { %v91_v4 = vsub.f32 %v87_v0, %v89_v2 }
   0x4   :  { %7 = vsyncpa [#allocation4], 0  ;;  %v92_v5 = vsub.f32 %v88_v1, %v90_v3  ;;  %s125_s18 = sshll.u32 %s197_s2, 4  ;;  %s164_s19 = smov [#allocation3]   ;;  %s126_s18 = int_to_ptr.hbm [resolvable:$true] %s125_s18 }
   0x5   :  { %v93_v6 = vmul.f32 %v91_v4, %v91_v4 }
   0x6   :  { %v94_v7 = vmul.f32 %v92_v5, %v92_v5 }
   0x8   :  { %v108_v8 = vadd.f32 %v94_v7, %v93_v6 }
   0xa   :  { %109 = vadd.xlane.f32.xlu0 %v108_v8 }
  0x7d   :  { %v110_v9 = vpop.xlane.xlu0 %109 }
  0x7e   :  { %v111_v10 = vrot.slane %v110_v9, 4 }
  0x80   :  { %v112_v11 = vadd.f32 %v111_v10, %v110_v9 }
  0x82   :  { %v113_v12 = vrot.slane %v112_v11, 2 }
  0x84   :  { %v114_v13 = vadd.f32 %v113_v12, %v112_v11 }
  0x86   :  { %v115_v14 = vrot.slane %v114_v13, 1 }
  0x88   :  { %v116_v15 = vadd.f32 %v115_v14, %v114_v13 }
  0x8a   :  { %147 = vpush %v116_v15 }
  0xbb   :  { %s148_s1 = spop %147 }
  0xbc   :  { %119 = sst [smem:[#allocation3]] %s148_s1 }
  0xbd   :  { %128 = dma.smem_to_hbm %s164_s19, 16, %s126_s18, [#allocation4]  }
  0xbe   :  { %162 = dma.done.wait [#allocation4], 16  }
  0xbf   :  { %163 = vsyncadd [#allocation4], 4294967280 }
  0xc0   :  { %133 = sfence }
  0xc1   :  { %134 = vsyncpa [#allocation4], 1 }

</bundles_post_ra>
